<compile_context>
chip_gen: v7x
topology: tpu7x:2x2x1
jax: 0.10.0
libtpu: 0.0.40
codegen_flags: <defaults>
</compile_context>

<pallas_src>
import functools

import jax
import jax.numpy as jnp
from jax.experimental import pallas as pl
from jax.experimental.pallas import tpu as pltpu

SIGMA_DATA = 0.5


def _nv_denoiser_kernel(sig_ref, x_ref, cc_ref, wbd_ref, wcc_ref, b_ref,
                        tb_ref, o_ref):
    """One grid step == one (batch element, frame chunk), packed layout.

    sig_ref : VMEM (fb*C, 1)    f32 -- sigma, replicated C times per frame
    x_ref   : VMEM (fb*C, HW)       -- noisy latent slab (frame-major, ch-minor)
    cc_ref  : VMEM (CC,   HW)       -- cond['concat'] of this batch element
    wbd_ref : VMEM (fb*C, fb*C) f32 -- block-diag of fb copies of w[:C]^T
    wcc_ref : VMEM (fb*C, CC)   f32 -- w[C:]^T tiled fb times along rows
    b_ref   : VMEM (fb*C, 1)    f32 -- conv bias, tiled fb times
    tb_ref  : VMEM (fb*C, 1)    f32 -- c_noise embedding direction, tiled
    o_ref   : VMEM (fb*C, HW)       -- denoised output slab
    """
    sd = jnp.float32(SIGMA_DATA)
    sd2 = sd * sd

    # --- DenoiserScaling (EDM), vectorised over the whole chunk -------------
    # Input contract: sigma > 0 (c_noise = 0.25 * log(sigma)).
    s = sig_ref[...]                           # (fb*C, 1)
    c_in = jax.lax.rsqrt(s * s + sd2)          # 1 / sqrt(sigma^2 + sd^2)
    c_skip = sd2 * c_in * c_in                 # sd^2 / (sigma^2 + sd^2)
    c_out = (sd * s) * c_in                    # sigma*sd / sqrt(sigma^2+sd^2)
    c_noise = 0.25 * jnp.log(s)
    a_x = c_out * c_in                         # folded scale of the x mix
    bias = c_out * (b_ref[...] + c_noise * tb_ref[...])      # (fb*C, 1)

    x = x_ref[...]                                            # (fb*C, HW)
    # Per-frame (C, C) channel mix for the whole chunk in one dense MXU dot.
    mix = jnp.dot(wbd_ref[...], x, preferred_element_type=jnp.float32)
    # Frame-shared concat projection; row tiling broadcasts it over frames.
    ccb = jnp.dot(wcc_ref[...], cc_ref[...],
                  preferred_element_type=jnp.float32)         # (fb*C, HW)

    # out = c_out*(Wx@(c_in*x) + Wcc@cc + b + c_noise*tb) + c_skip*x
    out = a_x * mix + c_skip * x + (c_out * ccb + bias)
    o_ref[...] = out.astype(o_ref.dtype)


def _pick_frame_block(depth, c, hw, itemsize, budget_bytes=24 << 20):
    """Largest frame chunk (divisor of depth) whose double-buffered input AND
    output slabs plus the block-diagonal mix weight fit a conservative VMEM
    budget (safe under v7x's 64 MiB per TensorCore).  fb*C must be a sublane
    multiple (8) unless the chunk covers all frames."""
    divisors = [d for d in range(1, depth + 1) if depth % d == 0]
    valid = [d for d in divisors if (d * c) % 8 == 0 or d == depth]

    def resident(fb):
        slab = fb * c * hw * itemsize
        wbd = (fb * c) * (fb * c) * 4
        return 4 * slab + 2 * wbd        # 2x double-buffered in + out, 2x wbd

    fb = valid[0]
    for d in valid:
        if resident(d) <= budget_bytes:
            fb = max(fb, d)
    return fb


@functools.partial(jax.jit, static_argnames=("depth",))
def nv_denoiser_forward(inp_bfchw, sigma, cond_crossattn, cond_concat,
                        w, b, tb, *, depth):
    """Mirrors NVDenoiser.forward.

    inp_bfchw      : (b, f, C, H, W)   PyTorch NCHW (+ frame axis)
    sigma          : (b*f,)            (must be > 0 for c_noise = 0.25*log)
    cond_crossattn : (b, L, D)
    cond_concat    : (b, CC, H, W)
    """
    bs, num_frames, C, H, W = inp_bfchw.shape
    # NVDenoiser overrides num_frames with self.depth after the (b f) reshape;
    # the cond dedup below only makes sense when they agree.
    if num_frames != depth:
        raise ValueError(
            f"NVDenoiser kernel requires num_frames == depth "
            f"(got {num_frames} vs {depth})")

    HW = H * W
    BF = bs * depth
    CC = cond_concat.shape[1]

    # TODO(synk): crossattn / image_only_indicator / num_video_frames feed the
    # real UNet's cross-attention & temporal layers; the synthetic stand-in
    # network in the kernel does not consume them, so the depth-times repeat
    # of cond['crossattn'] is intentionally not materialised here.
    del cond_crossattn

    # Free, contiguous reshapes only: frames*channels on sublanes, HW on lanes.
    x3 = inp_bfchw.reshape(bs, depth * C, HW)
    cc3 = cond_concat.reshape(bs, CC, HW)

    # Keep every store lane-dense: pad HW up to a multiple of 128 if needed.
    HW_pad = max(128, ((HW + 127) // 128) * 128)
    if HW_pad != HW:
        x3 = jnp.pad(x3, ((0, 0), (0, 0), (0, HW_pad - HW)))
        cc3 = jnp.pad(cc3, ((0, 0), (0, 0), (0, HW_pad - HW)))

    # sigma replicated C times per frame -> broadcasts directly over the
    # packed (fb*C, HW) slab inside the kernel (one rsqrt/log per chunk).
    sig3 = jnp.repeat(sigma.astype(jnp.float32).reshape(bs, depth, 1), C,
                      axis=2).reshape(bs, depth * C, 1)

    itemsize = jnp.dtype(inp_bfchw.dtype).itemsize
    fb = _pick_frame_block(depth, C, HW_pad, itemsize)
    n_fc = depth // fb
    FB = fb * C
    grid = (bs, n_fc)

    # One-time parameter re-layouts (stand-in 1x1 conv weight, split & tiled).
    wx_t = jnp.transpose(w[:C]).astype(jnp.float32)         # (C_out, C_in)
    wcc_t = jnp.transpose(w[C:]).astype(jnp.float32)        # (C_out, CC)
    w_bd = jnp.kron(jnp.eye(fb, dtype=jnp.float32), wx_t)   # (FB, FB) blockdiag
    wcc_til = jnp.tile(wcc_t, (fb, 1))                      # (FB, CC)
    b_til = jnp.tile(b.reshape(C, 1).astype(jnp.float32), (fb, 1))
    tb_til = jnp.tile(tb.reshape(C, 1).astype(jnp.float32), (fb, 1))

    # VMEM accounting: double-buffered x-in + x-out, double-buffered cc and
    # weights; explicit limit, capped well under v7x's 64 MiB per TensorCore.
    cc_item = jnp.dtype(cond_concat.dtype).itemsize
    slab = FB * HW_pad * itemsize
    est = (4 * slab + 2 * CC * HW_pad * cc_item
           + 2 * FB * FB * 4 + 2 * FB * CC * 4 + 8 * FB * 4)
    vmem_limit = int(min(48 << 20, max(16 << 20, est + (8 << 20))))

    flops = grid[0] * grid[1] * (2 * FB * FB + 2 * FB * CC) * HW_pad
    bytes_accessed = int(2 * BF * C * HW_pad * itemsize
                         + bs * CC * HW_pad * cc_item
                         + 4 * (FB * FB + FB * CC + 3 * FB) + 4 * BF * C)
    cost = pl.CostEstimate(flops=flops, transcendentals=2 * BF * C,
                           bytes_accessed=bytes_accessed)

    out3 = pl.pallas_call(
        _nv_denoiser_kernel,
        out_shape=jax.ShapeDtypeStruct((bs, depth * C, HW_pad),
                                       inp_bfchw.dtype),
        grid=grid,
        in_specs=[
            pl.BlockSpec((None, FB, 1), lambda i, j: (i, j, 0)),       # sigma
            pl.BlockSpec((None, FB, HW_pad), lambda i, j: (i, j, 0)),  # x slab
            # concat cond: same block for every frame chunk of batch elem i
            # (inner 'arbitrary' axis -> Pallas skips the re-fetch).
            pl.BlockSpec((None, CC, HW_pad), lambda i, j: (i, 0, 0)),
            pl.BlockSpec((FB, FB), lambda i, j: (0, 0)),               # W blockdiag
            pl.BlockSpec((FB, CC), lambda i, j: (0, 0)),               # W_cc tiled
            pl.BlockSpec((FB, 1), lambda i, j: (0, 0)),                # bias tiled
            pl.BlockSpec((FB, 1), lambda i, j: (0, 0)),                # tb tiled
        ],
        out_specs=pl.BlockSpec((None, FB, HW_pad), lambda i, j: (i, j, 0)),
        compiler_params=pltpu.CompilerParams(
            # Megacore parallelism comes from the batch axis; the frame-chunk
            # axis stays 'arbitrary' so the concat dedup is preserved and no
            # extra per-step overhead is forced on single-TC chips.
            dimension_semantics=("parallel", "arbitrary"),
            vmem_limit_bytes=vmem_limit),
        cost_estimate=cost,
    )(sig3, x3, cc3, w_bd, wcc_til, b_til, tb_til)

    if HW_pad != HW:
        out3 = out3[..., :HW]
    # PyTorch forward returns the flattened (b*f) batch in NCHW.
    return out3.reshape(BF, C, H, W)


def _reference_forward(inp_bfchw, sigma, cond_concat, w, b, tb, depth):
    """Pure-JAX reference of the same semantics (for verification)."""
    bs, f, C, H, W = inp_bfchw.shape
    x = inp_bfchw.reshape(bs * f, C, H, W)
    concat = jnp.repeat(cond_concat[:, None], depth, axis=1)
    concat = concat.reshape((bs * depth,) + cond_concat.shape[1:])

    s = sigma[:, None, None, None]
    denom = s * s + SIGMA_DATA ** 2
    c_skip = SIGMA_DATA ** 2 / denom
    c_out = s * SIGMA_DATA / jnp.sqrt(denom)
    c_in = 1.0 / jnp.sqrt(denom)
    c_noise = 0.25 * jnp.log(sigma)

    net_in = jnp.concatenate([x * c_in, concat], axis=1)     # (BF, C+CC, H, W)
    net = jnp.einsum("nchw,cd->ndhw", net_in, w)
    net = net + b[0][None, :, None, None] \
              + c_noise[:, None, None, None] * tb[0][None, :, None, None]
    return net * c_out + x * c_skip


if __name__ == "__main__":
    key = jax.random.PRNGKey(0)
    k_x, k_s, k_ca, k_cc, k_w, k_b, k_tb = jax.random.split(key, 7)

    bs, depth, C, H, W = 2, 4, 4, 16, 16     # num_frames == depth
    CC, L, D = 4, 8, 32
    BF = bs * depth

    inp = jax.random.normal(k_x, (bs, depth, C, H, W), dtype=jnp.float32)
    sigma = jnp.exp(jax.random.normal(k_s, (BF,), dtype=jnp.float32))  # > 0
    cond_crossattn = jax.random.normal(k_ca, (bs, L, D), dtype=jnp.float32)
    cond_concat = jax.random.normal(k_cc, (bs, CC, H, W), dtype=jnp.float32)

    # deterministic synthetic network parameters (1x1 conv C+CC -> C)
    w = jax.random.normal(k_w, (C + CC, C), dtype=jnp.float32) * 0.1
    b = jax.random.normal(k_b, (1, C), dtype=jnp.float32) * 0.1
    tb = jax.random.normal(k_tb, (1, C), dtype=jnp.float32) * 0.1

    out = nv_denoiser_forward(inp, sigma, cond_crossattn, cond_concat,
                              w, b, tb, depth=depth)
    out = jax.block_until_ready(out)

    ref = _reference_forward(inp, sigma, cond_concat, w, b, tb, depth)
    assert out.shape == (BF, C, H, W)
    assert jnp.allclose(out, ref, rtol=2e-3, atol=2e-3), \
        f"max abs err {jnp.max(jnp.abs(out - ref))}"

    print("KERNEL_OK")
</pallas_src>

<mosaic_0001>
module attributes {stable_mosaic.version = 11 : i64} {
  func.func @_nv_denoiser_kernel(%arg0: i32, %arg1: i32, %arg2: memref<1x16x1xf32, #tpu.memory_space<vmem>>, %arg3: memref<1x16x256xf32, #tpu.memory_space<vmem>>, %arg4: memref<1x4x256xf32, #tpu.memory_space<vmem>>, %arg5: memref<16x16xf32, #tpu.memory_space<vmem>>, %arg6: memref<16x4xf32, #tpu.memory_space<vmem>>, %arg7: memref<16x1xf32, #tpu.memory_space<vmem>>, %arg8: memref<16x1xf32, #tpu.memory_space<vmem>>, %arg9: memref<1x16x256xf32, #tpu.memory_space<vmem>>) attributes {dimension_semantics = [#tpu.dimension_semantics<parallel>, #tpu.dimension_semantics<arbitrary>], iteration_bounds = array<i64: 2, 1>, scalar_prefetch = 0 : i64, scratch_operands = 0 : i64, tpu.core_type = #tpu.core_type<tc>, window_params = [{transform_indices = @transform_0, window_bounds = array<i64: 1, 16, 1>}, {transform_indices = @transform_1, window_bounds = array<i64: 1, 16, 256>}, {transform_indices = @transform_2, window_bounds = array<i64: 1, 4, 256>}, {pipeline_mode = #tpu.pipeline_mode<synchronous>, transform_indices = @transform_3, window_bounds = array<i64: 16, 16>}, {pipeline_mode = #tpu.pipeline_mode<synchronous>, transform_indices = @transform_4, window_bounds = array<i64: 16, 4>}, {pipeline_mode = #tpu.pipeline_mode<synchronous>, transform_indices = @transform_5, window_bounds = array<i64: 16, 1>}, {pipeline_mode = #tpu.pipeline_mode<synchronous>, transform_indices = @transform_6, window_bounds = array<i64: 16, 1>}, {transform_indices = @transform_7, window_bounds = array<i64: 1, 16, 256>}]} {
    %cst = arith.constant 5.000000e-01 : f32
    %cst_0 = arith.constant 5.000000e-01 : f32
    %0 = arith.mulf %cst, %cst_0 : f32
    %c0 = arith.constant 0 : index
    %c0_1 = arith.constant 0 : index
    %c0_2 = arith.constant 0 : index
    %1 = vector.load %arg2[%c0, %c0_1, %c0_2] : memref<1x16x1xf32, #tpu.memory_space<vmem>>, vector<1x16x1xf32>
    %2 = vector.shape_cast %1 : vector<1x16x1xf32> to vector<16x1xf32>
    %3 = arith.mulf %2, %2 : vector<16x1xf32>
    %4 = vector.broadcast %0 : f32 to vector<16x1xf32>
    %5 = arith.addf %3, %4 : vector<16x1xf32>
    %6 = math.rsqrt %5 : vector<16x1xf32>
    %7 = vector.broadcast %0 : f32 to vector<16x1xf32>
    %8 = arith.mulf %7, %6 : vector<16x1xf32>
    %9 = arith.mulf %8, %6 : vector<16x1xf32>
    %cst_3 = arith.constant 5.000000e-01 : f32
    %10 = vector.broadcast %cst_3 : f32 to vector<16x1xf32>
    %11 = arith.mulf %10, %2 : vector<16x1xf32>
    %12 = arith.mulf %11, %6 : vector<16x1xf32>
    %13 = math.log %2 : vector<16x1xf32>
    %cst_4 = arith.constant 2.500000e-01 : f32
    %14 = vector.broadcast %cst_4 : f32 to vector<16x1xf32>
    %15 = arith.mulf %14, %13 : vector<16x1xf32>
    %16 = arith.mulf %12, %6 : vector<16x1xf32>
    %c0_5 = arith.constant 0 : index
    %c0_6 = arith.constant 0 : index
    %17 = vector.load %arg7[%c0_5, %c0_6] : memref<16x1xf32, #tpu.memory_space<vmem>>, vector<16x1xf32>
    %c0_7 = arith.constant 0 : index
    %c0_8 = arith.constant 0 : index
    %18 = vector.load %arg8[%c0_7, %c0_8] : memref<16x1xf32, #tpu.memory_space<vmem>>, vector<16x1xf32>
    %19 = arith.mulf %15, %18 : vector<16x1xf32>
    %20 = arith.addf %17, %19 : vector<16x1xf32>
    %21 = arith.mulf %12, %20 : vector<16x1xf32>
    %c0_9 = arith.constant 0 : index
    %c0_10 = arith.constant 0 : index
    %c0_11 = arith.constant 0 : index
    %22 = vector.load %arg3[%c0_9, %c0_10, %c0_11] : memref<1x16x256xf32, #tpu.memory_space<vmem>>, vector<1x16x256xf32>
    %23 = vector.shape_cast %22 : vector<1x16x256xf32> to vector<16x256xf32>
    %c0_12 = arith.constant 0 : index
    %c0_13 = arith.constant 0 : index
    %24 = vector.load %arg5[%c0_12, %c0_13] : memref<16x16xf32, #tpu.memory_space<vmem>>, vector<16x16xf32>
    %cst_14 = arith.constant dense<0.000000e+00> : vector<16x256xf32>
    %25 = tpu.matmul %24, %23, %cst_14 {dimension_numbers = #tpu.dot_dimension_numbers<[1], [0], [0], [1], [0, 0, 1, 1], [], []>} : vector<16x16xf32>, vector<16x256xf32>, vector<16x256xf32> -> vector<16x256xf32>
    %c0_15 = arith.constant 0 : index
    %c0_16 = arith.constant 0 : index
    %26 = vector.load %arg6[%c0_15, %c0_16] : memref<16x4xf32, #tpu.memory_space<vmem>>, vector<16x4xf32>
    %c0_17 = arith.constant 0 : index
    %c0_18 = arith.constant 0 : index
    %c0_19 = arith.constant 0 : index
    %27 = vector.load %arg4[%c0_17, %c0_18, %c0_19] : memref<1x4x256xf32, #tpu.memory_space<vmem>>, vector<1x4x256xf32>
    %28 = vector.shape_cast %27 : vector<1x4x256xf32> to vector<4x256xf32>
    %cst_20 = arith.constant dense<0.000000e+00> : vector<16x256xf32>
    %29 = tpu.matmul %26, %28, %cst_20 {dimension_numbers = #tpu.dot_dimension_numbers<[1], [0], [0], [1], [0, 0, 1, 1], [], []>} : vector<16x4xf32>, vector<4x256xf32>, vector<16x256xf32> -> vector<16x256xf32>
    %30 = vector.broadcast %16 : vector<16x1xf32> to vector<16x256xf32>
    %31 = arith.mulf %30, %25 : vector<16x256xf32>
    %32 = vector.broadcast %9 : vector<16x1xf32> to vector<16x256xf32>
    %33 = arith.mulf %32, %23 : vector<16x256xf32>
    %34 = arith.addf %31, %33 : vector<16x256xf32>
    %35 = vector.broadcast %12 : vector<16x1xf32> to vector<16x256xf32>
    %36 = arith.mulf %35, %29 : vector<16x256xf32>
    %37 = vector.broadcast %21 : vector<16x1xf32> to vector<16x256xf32>
    %38 = arith.addf %36, %37 : vector<16x256xf32>
    %39 = arith.addf %34, %38 : vector<16x256xf32>
    %c0_21 = arith.constant 0 : index
    %c0_22 = arith.constant 0 : index
    %c0_23 = arith.constant 0 : index
    %40 = vector.load %arg9[%c0_21, %c0_22, %c0_23] : memref<1x16x256xf32, #tpu.memory_space<vmem>>, vector<1x16x256xf32>
    %41 = vector.shape_cast %40 : vector<1x16x256xf32> to vector<16x256xf32>
    %42 = vector.shape_cast %39 : vector<16x256xf32> to vector<1x16x256xf32>
    tpu.vector_store %arg9[%c0_21, %c0_22, %c0_23], %42 {strides = array<i32>} : memref<1x16x256xf32, #tpu.memory_space<vmem>>, vector<1x16x256xf32>,
    return
  }
  func.func @transform_0(%arg0: i32, %arg1: i32) -> (i32, i32, i32) {
    %c0_i32 = arith.constant 0 : i32
    %c0_i32_0 = arith.constant 0 : i32
    return %arg0, %arg1, %c0_i32 : i32, i32, i32
  }
  func.func @transform_1(%arg0: i32, %arg1: i32) -> (i32, i32, i32) {
    %c0_i32 = arith.constant 0 : i32
    %c0_i32_0 = arith.constant 0 : i32
    return %arg0, %arg1, %c0_i32 : i32, i32, i32
  }
  func.func @transform_2(%arg0: i32, %arg1: i32) -> (i32, i32, i32) {
    %c0_i32 = arith.constant 0 : i32
    %c0_i32_0 = arith.constant 0 : i32
    %c0_i32_1 = arith.constant 0 : i32
    return %arg0, %c0_i32, %c0_i32_0 : i32, i32, i32
  }
  func.func @transform_3(%arg0: i32, %arg1: i32) -> (i32, i32) {
    %c0_i32 = arith.constant 0 : i32
    %c0_i32_0 = arith.constant 0 : i32
    %c0_i32_1 = arith.constant 0 : i32
    return %c0_i32, %c0_i32_0 : i32, i32
  }
  func.func @transform_4(%arg0: i32, %arg1: i32) -> (i32, i32) {
    %c0_i32 = arith.constant 0 : i32
    %c0_i32_0 = arith.constant 0 : i32
    %c0_i32_1 = arith.constant 0 : i32
    return %c0_i32, %c0_i32_0 : i32, i32
  }
  func.func @transform_5(%arg0: i32, %arg1: i32) -> (i32, i32) {
    %c0_i32 = arith.constant 0 : i32
    %c0_i32_0 = arith.constant 0 : i32
    %c0_i32_1 = arith.constant 0 : i32
    return %c0_i32, %c0_i32_0 : i32, i32
  }
  func.func @transform_6(%arg0: i32, %arg1: i32) -> (i32, i32) {
    %c0_i32 = arith.constant 0 : i32
    %c0_i32_0 = arith.constant 0 : i32
    %c0_i32_1 = arith.constant 0 : i32
    return %c0_i32, %c0_i32_0 : i32, i32
  }
  func.func @transform_7(%arg0: i32, %arg1: i32) -> (i32, i32, i32) {
    %c0_i32 = arith.constant 0 : i32
    %c0_i32_0 = arith.constant 0 : i32
    return %arg0, %arg1, %c0_i32 : i32, i32, i32
  }
}

</mosaic_0001>

<bundles_post_ra>
// kernel: nv_denoiser_forward.1
= control target key start
LH: loop header
LB: loop body
LE: loop exit
PB: predicated region body
PF: predicated region fallthrough
CT: control target
= control target key end

     0   :  { %s923_s24 = smov 0   ;;  %s925_s25 = smov 0   ;;  %s1015_s0 = inlined_call_operand.vmem [shape: f32[2,16,1], index: 0, kind: input, shape index: {}]   ;;  %s1016_s1 = inlined_call_operand.vmem [shape: f32[2,16,256], index: 1, kind: input, shape index: {}]   ;;  %s1017_s2 = inlined_call_operand.vmem [shape: f32[2,4,256], index: 2, kind: input, shape index: {}]   ;;  %s1018_s3 = inlined_call_operand.vmem [shape: f32[16,16], index: 3, kind: input, shape index: {}]   ;;  %s1019_s4 = inlined_call_operand.vmem [shape: f32[16,4], index: 4, kind: input, shape index: {}]   ;;  %s1020_s5 = inlined_call_operand.vmem [shape: f32[16,1], index: 5, kind: input, shape index: {}]   ;;  %s1021_s6 = inlined_call_operand.vmem [shape: f32[16,1], index: 6, kind: input, shape index: {}]   ;;  %s1022_s7 = inlined_call_operand.vmem [shape: f32[2,16,256], index: 7, kind: output, shape index: {}]  }
   0x1   :  { %s927_s26 = smov 0  }
   0x2 LB: > { %s29_s27 = sadd.s32 1, %s875_s25  ;;  %p795_p0 = scmp.ge.s32.totalorder %s879_s26, 1  ;;  %s879_s26 = sphi %s927_s26, %s17_s26   ;;  %s875_s25 = sphi %s925_s25, %s1024_s25   ;;  %s871_s24 = sphi %s923_s24, %s1023_s24  }
   0x3   : > { %p31_p1 = scmp.ge.s32.totalorder %s29_s27, 2  ;;  %p286_p2 = scmp.lt.s32.totalorder %s879_s26, 3 }
   0x5   : > { %s1026_s27 = smov (%p31_p1, %s29_s27), 0  ;;  %p287_p3 = pnand %p795_p0, %p286_p2 }
   0x6   : > { %p343_p4 = scmp.lt.s32.totalorder (!%p287_p3), %s871_s24, 1  ;;  %v881_v0 = vmov (!%p287_p3), 0.0   ;;  %v882_v1 = vmov (!%p287_p3), 0   ;;  %vm515_vm0 = vcmask (!%p287_p3), 1043456   ;;  %v503_v12 = vld [vmem:[%s1019_s4] sm:$0xff] (!%p287_p3)  ;;  %vm508_vm1 = vcmask (!%p287_p3), 31744  }
   0x7   : > { %290 = sbr.rel (%p287_p3) target bundleno = 248 (0xf8), region = 48  ;;  %584 = vmatprep.mubr.f32.mxu1 (!%p287_p3), %v881_v0  ;;  %490 = vmatprep.mubr.f32.mxu0 (!%p287_p3), %v881_v0  ;;  %v417_v15 = vld [vmem:[%s1018_s3] sm:$0xff] (!%p287_p3)  ;;  %vm419_vm2 = vcmask (!%p287_p3), 130048   ;;  %v504_v18 = vld [vmem:[%s1019_s4 + $0x8] sm:$0xff] (!%p287_p3) }
   0x8   : > { %847 = vset.pattern.permute.xlu1 (!%p287_p3), %v882_v1  ;;  %846 = vset.pattern.permute.xlu0 (!%p287_p3), %v882_v1  ;;  %v418_v19 = vld [vmem:[%s1018_s3 + $0x8] sm:$0xff] (!%p287_p3)  ;;  %v405_v32 = vld [vmem:[%s1021_s6] sm:$0xff] (!%p287_p3) }
   0x9   : > { %v406_v29 = vld [vmem:[%s1021_s6 + $0x8] sm:$0xff] (!%p287_p3)  ;;  %v403_v41 = vld [vmem:[%s1020_s5] sm:$0xff] (!%p287_p3) }
   0xa   : > { %v404_v40 = vld [vmem:[%s1020_s5 + $0x8] sm:$0xff] (!%p287_p3) }
   0xe   : > { %s1028_s24 = smov (!%p343_p4, %s871_s24), 1 }
   0xf   : > { %s813_s28 = sshll.u32 %s1028_s24, 5  ;;  %s814_s29 = sshll.u32 %s1028_s24, 3 }
  0x10   : > { %s361_s9 = scalar_lea.vmem %s1016_s1, %s813_s28  ;;  %s367_s12 = scalar_lea.vmem %s1017_s2, %s814_s29 }
  0x11   : > { %v950_v2 = vld [vmem:[%s361_s9 + $0x8] sm:$0xff]  ;;  %v952_v3 = vld [vmem:[%s361_s9 + $0x18] sm:$0xff]  ;;  %v957_v4 = vld [vmem:[%s361_s9] sm:$0xff]  ;;  %s812_s13 = sshll.u32 %s1028_s24, 4  ;;  %s377_s17 = scalar_lea.vmem %s1022_s7, %s813_s28 }
  0x12   : > { %v816_v5 = vpack.c.bf16 %v952_v3, %v950_v2  ;;  %v505_v6 = vld [vmem:[%s367_s12] sm:$0xff]  ;;  %v962_v7 = vld [vmem:[%s361_s9 + $0x10] sm:$0xff]  ;;  %s350_s16 = scalar_lea.vmem %s1015_s0, %s812_s13 }
  0x13   : > { %v507_v8 = vcombine.high %v505_v6, %v505_v6  ;;  %v818_v9 = vpack.c.bf16 %v962_v7, %v957_v4  ;;  %v380_v10 = vld [vmem:[%s350_s16 + $0x8] sm:$0xff]  ;;  %v379_v11 = vld [vmem:[%s350_s16] sm:$0xff] }
  0x14   : > { %817 = vmatprep.subr.bf16.mxu0 %v816_v5  ;;  %v382_v13 = vmul.f32 %v380_v10, %v380_v10  ;;  %849 = vlog2.f32 %v380_v10  ;;  %v381_v14 = vmul.f32 %v379_v11, %v379_v11  ;;  %v392_v22 = vmul.f32 0.5, %v380_v10 }
  0x15   : > { %806 = vmatprep.subr.msk.mxu1 %vm515_vm0, %v507_v8  ;;  %819 = vmatpush1.bf16.msra.mxu0 %v818_v9  ;;  %851 = vlog2.f32 %v379_v11  ;;  %v391_v24 = vmul.f32 0.5, %v379_v11 }
  0x16   : > { %807 = vmatpush1.msk.msra.mxu1 %vm515_vm0, %v505_v6  ;;  %v384_v16 = vadd.f32 0.25, %v382_v13  ;;  %v383_v17 = vadd.f32 0.25, %v381_v14 }
  0x17   : > { %808 = vmatmul.mubr.msk.f32.vlgmr.msra.gmra.mrb[0].mxu1 %vm508_vm1, %v503_v12 }
  0x18   : > { %804 = vmatmul.mubr.msk.f32.vlgmr.msra.gmra.mrb[0].mxu0 %vm419_vm2, %v417_v15  ;;  %590 = vmatprep.mubr.f32.mxu1 %v881_v0  ;;  %853 = vrsqrt.f32 %v384_v16 }
  0x19   : > { %496 = vmatprep.mubr.f32.mxu0 %v881_v0  ;;  %855 = vrsqrt.f32 %v383_v17 }
  0x1b   : > { %809 = vmatmul.mubr.msk.f32.gmra.mrb[2].mxu1 %vm508_vm1, %v504_v18 }
  0x1c   : > { %805 = vmatmul.mubr.msk.f32.gmra.mrb[2].mxu0 %vm419_vm2, %v418_v19 }
  0x1e   : > { %v850_v20 = vpop.eup %849 }
  0x1f   : > { %v852_v21 = vpop.eup %851  ;;  %v398_v23 = vmul.f32 0.6931472, %v850_v20 }
  0x20   : > { %v396_v25 = vmul.f32 0.6931472, %v852_v21 }
  0x21   : > { %v400_v26 = vmul.f32 0.25, %v398_v23 }
  0x22   : > { %v854_v27 = vpop.eup %853  ;;  %v399_v28 = vmul.f32 0.25, %v396_v25 }
  0x23   : > { %v856_v30 = vpop.eup %855  ;;  %v394_v31 = vmul.f32 %v854_v27, %v392_v22  ;;  %v388_v35 = vmul.f32 0.25, %v854_v27  ;;  %v408_v36 = vmul.f32 %v406_v29, %v400_v26 }
  0x24   : > { %v393_v33 = vmul.f32 %v856_v30, %v391_v24  ;;  %v387_v34 = vmul.f32 0.25, %v856_v30  ;;  %v407_v39 = vmul.f32 %v405_v32, %v399_v28 }
  0x25   : > { %636 = vperm.xlu1 %847, %v394_v31   ;;  %v390_v42 = vmul.f32 %v854_v27, %v388_v35  ;;  %v410_v43 = vadd.f32 %v408_v36, %v404_v40  ;;  %v402_v44 = vmul.f32 %v854_v27, %v394_v31 }
  0x26   : > { %631 = vperm.xlu0 %846, %v393_v33   ;;  %v401_v37 = vmul.f32 %v856_v30, %v393_v33  ;;  %v389_v38 = vmul.f32 %v856_v30, %v387_v34  ;;  %v409_v45 = vadd.f32 %v407_v39, %v403_v41 }
  0x27   : > { %v412_v46 = vmul.f32 %v410_v43, %v394_v31 }
  0x28   : > { %v411_v47 = vmul.f32 %v409_v45, %v393_v33 }
  0x29   : > { %613 = vperm.xlu1 %847, %v389_v38  }
  0x2a   : > { %599 = vperm.xlu0 %846, %v401_v37  }
  0x2d   : > { %618 = vperm.xlu1 %847, %v390_v42  }
  0x2e   : > { %604 = vperm.xlu0 %846, %v402_v44  }
  0x31   : > { %650 = vperm.xlu1 %847, %v412_v46  }
  0x32   : > { %645 = vperm.xlu0 %846, %v411_v47  }
  0xa4   : > { %v637_v49 = vpop.permute.xlu1 %636 }
  0xa5   : > { %v632_v48 = vpop.permute.xlu0 %631 }
  0xa8   : > { %v614_v51 = vpop.permute.xlu1 %613 }
  0xa9   : > { %v600_v50 = vpop.permute.xlu0 %599  ;;  %v621_v58 = vmul.f32 %v614_v51, %v957_v4  ;;  %v622_v62 = vmul.f32 %v614_v51, %v950_v2 }
  0xac   : > { %v619_v53 = vpop.permute.xlu1 %618 }
  0xad   : > { %v605_v52 = vpop.permute.xlu0 %604  ;;  %v623_v12 = vmul.f32 %v619_v53, %v962_v7  ;;  %v624_v16 = vmul.f32 %v619_v53, %v952_v3 }
  0xb0   : > { %v651_v17 = vpop.permute.xlu1 %650 }
  0xb1   : > { %v646_v63 = vpop.permute.xlu0 %645 }
  0xea   : > { %v586_v54 = vpop.f32.mrb[0].mxu1 }
  0xeb   : > { %v639_v55 = vmul.f32 %v632_v48, %v586_v54  ;;  %v588_v56 = vpop.f32.mrb[1].mxu1  ;;  %v492_v57 = vpop.f32.mrb[0].mxu0 }
  0xec   : > { %v640_v59 = vmul.f32 %v632_v48, %v588_v56  ;;  %v607_v60 = vmul.f32 %v600_v50, %v492_v57  ;;  %v494_v61 = vpop.f32.mrb[1].mxu0 }
  0xed   : > { %v608_v0 = vmul.f32 %v600_v50, %v494_v61  ;;  %v653_v1 = vadd.f32 %v646_v63, %v639_v55 }
  0xee   : > { %v625_v5 = vadd.f32 %v621_v58, %v607_v60  ;;  %v592_v6 = vpop.f32.mrb[2].mxu1  ;;  %v654_v8 = vadd.f32 %v646_v63, %v640_v59 }
  0xef   : > { %v626_v9 = vadd.f32 %v622_v62, %v608_v0  ;;  %v641_v10 = vmul.f32 %v637_v49, %v592_v6  ;;  %v594_v11 = vpop.f32.mrb[3].mxu1  ;;  %v498_v4 = vpop.f32.mrb[2].mxu0 }
  0xf0   : > { %v657_v13 = vadd.f32 %v653_v1, %v625_v5  ;;  %v642_v14 = vmul.f32 %v637_v49, %v594_v11  ;;  %v609_v2 = vmul.f32 %v605_v52, %v498_v4  ;;  %v500_v15 = vpop.f32.mrb[3].mxu0 }
  0xf1   : > { %v658_v18 = vadd.f32 %v654_v8, %v626_v9  ;;  %v610_v19 = vmul.f32 %v605_v52, %v500_v15  ;;  %v655_v20 = vadd.f32 %v651_v17, %v641_v10 }
  0xf2   : > { %661 = vst [vmem:[%s377_s17] sm:$0xff] %v657_v13  ;;  %v627_v21 = vadd.f32 %v623_v12, %v609_v2  ;;  %v656_v22 = vadd.f32 %v651_v17, %v642_v14 }
  0xf3   : > { %662 = vst [vmem:[%s377_s17 + $0x8] sm:$0xff] %v658_v18  ;;  %v628_v23 = vadd.f32 %v624_v16, %v610_v19 }
  0xf4   : > { %v659_v24 = vadd.f32 %v655_v20, %v627_v21 }
  0xf5   : > { %v660_v25 = vadd.f32 %v656_v22, %v628_v23 }
  0xf6   : > { %663 = vst [vmem:[%s377_s17 + $0x10] sm:$0xff] %v659_v24 }
  0xf7   : > { %664 = vst [vmem:[%s377_s17 + $0x18] sm:$0xff] %v660_v25 }
  0xf8 PF: > { %s17_s26 = sadd.s32 1, %s879_s26   ;;  %s1023_s24 = smov %s875_s25 }
  0xf9   : > { %p14_p5 = scmp.ge.s32.totalorder %s17_s26, 4   ;;  %s1024_s25 = smov %s1026_s27 }
  0xfb   :  { %16 = sbr.rel (!%p14_p5) target bundleno = 2 (0x2), region = 84 }

</bundles_post_ra>
